<compile_context>
chip_gen: v7x
topology: tpu7x:2x2x1
jax: 0.10.0
libtpu: 0.0.40
codegen_flags: <defaults>
</compile_context>

<pallas_src>
import functools

import jax
import jax.numpy as jnp
import numpy as np
from jax.experimental import pallas as pl
from jax.experimental.pallas import tpu as pltpu


def _round_up(x, m):
    return ((x + m - 1) // m) * m


# ------------- Pass 1: per-batch BN moments of y = W @ x (no y to HBM) -------
def _stats_kernel(x_ref, w_ref, sum_ref, sq_ref, *, n_true, tile_n, needs_mask):
    i = pl.program_id(1)

    x = x_ref[...]
    if needs_mask:
        # Mask lanes of the overhanging last tile so garbage columns never
        # enter the statistics.  (Compiled out when N % tile == 0.)
        col = jax.lax.broadcasted_iota(jnp.int32, x_ref.shape, 1) + i * tile_n
        x = jnp.where(col < n_true, x, 0.0)

    # 1x1 conv == tiny channel matmul; recomputed in pass 2, never stored.
    y = jnp.dot(w_ref[...], x, preferred_element_type=jnp.float32)

    @pl.when(i == 0)
    def _():
        sum_ref[...] = jnp.zeros_like(sum_ref)
        sq_ref[...] = jnp.zeros_like(sq_ref)

    sum_ref[...] += jnp.sum(y, axis=1, keepdims=True)
    sq_ref[...] += jnp.sum(y * y, axis=1, keepdims=True)


# ------------- Pass 2: fused 1x1 conv + BatchNorm(affine) + ReLU -------------
def _conv_bn_relu_kernel(x_ref, w_ref, scale_ref, shift_ref, o_ref):
    # Column j of y depends only on column j of x, so garbage lanes in an
    # overhanging input block only produce garbage output lanes, which Pallas
    # masks on writeback — no explicit masking needed here.
    y = jnp.dot(w_ref[...], x_ref[...], preferred_element_type=jnp.float32)
    o_ref[...] = jnp.maximum(y * scale_ref[...] + shift_ref[...], 0.0)


def _conv1x1_bn_relu(x_bcn, w, gamma, beta, *, eps=1e-5, tile_n=2048):
    """x_bcn: (B, Cin2, N) f32;  w: (Cout2, Cin2).  Returns (B, Cout2, N)."""
    B, cin, N = x_bcn.shape
    cout = w.shape[0]

    # Adaptive lane tile: big tiles amortize per-grid-step overhead.  Block
    # last dim is either a multiple of 128 (< N) or equals the full N.
    if _round_up(N, 128) <= tile_n:
        tile = N                    # single full-extent block per batch
    else:
        tile = tile_n               # multiple of 128; last block may overhang
    nt = pl.cdiv(N, tile)
    needs_mask = (N % tile) != 0
    grid = (B, nt)

    sums, sqs = pl.pallas_call(
        functools.partial(
            _stats_kernel, n_true=N, tile_n=tile, needs_mask=needs_mask),
        out_shape=(
            jax.ShapeDtypeStruct((B, cout, 1), jnp.float32),
            jax.ShapeDtypeStruct((B, cout, 1), jnp.float32),
        ),
        grid=grid,
        in_specs=[
            pl.BlockSpec((None, cin, tile), lambda b, i: (b, 0, i)),
            pl.BlockSpec((cout, cin), lambda b, i: (0, 0)),
        ],
        out_specs=(
            pl.BlockSpec((None, cout, 1), lambda b, i: (b, 0, 0)),
            pl.BlockSpec((None, cout, 1), lambda b, i: (b, 0, 0)),
        ),
        compiler_params=pltpu.CompilerParams(
            dimension_semantics=("parallel", "arbitrary")),
    )(x_bcn, w)

    # Tiny per-channel scalar math stays in plain JAX.
    m_true = jnp.float32(B * N)
    total = jnp.sum(sums, axis=0)                 # (cout, 1)
    total_sq = jnp.sum(sqs, axis=0)               # (cout, 1)
    mean = total / m_true
    var = jnp.maximum(total_sq / m_true - mean * mean, 0.0)   # biased (train BN)
    scale = gamma.reshape(-1, 1) / jnp.sqrt(var + eps)
    shift = beta.reshape(-1, 1) - mean * scale

    out = pl.pallas_call(
        _conv_bn_relu_kernel,
        out_shape=jax.ShapeDtypeStruct((B, cout, N), jnp.float32),
        grid=grid,
        in_specs=[
            pl.BlockSpec((None, cin, tile), lambda b, i: (b, 0, i)),
            pl.BlockSpec((cout, cin), lambda b, i: (0, 0)),
            pl.BlockSpec((cout, 1), lambda b, i: (0, 0)),
            pl.BlockSpec((cout, 1), lambda b, i: (0, 0)),
        ],
        out_specs=pl.BlockSpec((None, cout, tile), lambda b, i: (b, 0, i)),
        compiler_params=pltpu.CompilerParams(
            dimension_semantics=("parallel", "parallel")),
    )(x_bcn, w, scale, shift)
    return out


@functools.partial(jax.jit, static_argnames=("eps", "tile_n"))
def fourier_unit(x, conv_w, gamma, beta, *, eps=1e-5, tile_n=2048):
    """x: (B, C, F, W) float32 (NCHW).  conv_w: (2*out_c, 2*in_c, 1, 1)."""
    B, C, F, W = x.shape
    cout2 = conv_w.shape[0]

    # rfft along the "frequency" (H) axis, ortho norm.
    ff = jnp.fft.rfft(x, axis=-2, norm="ortho")          # (B, C, Ff, W) complex
    Ff = ff.shape[-2]

    # Interleave real/imag on channels: channel = 2*c + {0: re, 1: im}.
    # Pure contiguous reshapes below — no transpose, no pad, no extra HBM pass.
    stacked = jnp.stack([ff.real, ff.imag], axis=2)      # (B, C, 2, Ff, W)
    x_bcn = stacked.reshape(B, 2 * C, Ff * W)            # (B, 2C, N)

    w2 = conv_w.reshape(cout2, 2 * C).astype(jnp.float32)

    out_bcn = _conv1x1_bn_relu(x_bcn, w2, gamma, beta, eps=eps, tile_n=tile_n)

    out_c = cout2 // 2
    out = out_bcn.reshape(B, out_c, 2, Ff, W)            # channel = 2*j + {re, im}
    comp = out[:, :, 0] + 1j * out[:, :, 1]              # (B, out_c, Ff, W)
    return jnp.fft.irfft(comp, axis=2, norm="ortho")     # (B, out_c, F, W)


def fourier_unit_ref(x, conv_w, gamma, beta, eps=1e-5):
    """Pure-JAX reference mirroring the PyTorch forward (training-mode BN)."""
    B, C, F, W = x.shape
    ff = jnp.fft.rfft(x, axis=-2, norm="ortho")
    Ff = ff.shape[-2]
    st = jnp.stack([ff.real, ff.imag], axis=2).reshape(B, 2 * C, Ff, W)
    w2 = conv_w.reshape(conv_w.shape[0], -1)
    y = jnp.einsum("oc,bchw->bohw", w2, st)
    mean = y.mean(axis=(0, 2, 3), keepdims=True)
    var = y.var(axis=(0, 2, 3), keepdims=True)           # biased, like PyTorch BN
    yn = gamma.reshape(1, -1, 1, 1) * (y - mean) / jnp.sqrt(var + eps) \
        + beta.reshape(1, -1, 1, 1)
    yr = jnp.maximum(yn, 0.0)
    out_c = conv_w.shape[0] // 2
    yr = yr.reshape(B, out_c, 2, Ff, W)
    comp = yr[:, :, 0] + 1j * yr[:, :, 1]
    return jnp.fft.irfft(comp, axis=2, norm="ortho")


if __name__ == "__main__":
    key = jax.random.PRNGKey(0)
    k1, k2, k3, k4 = jax.random.split(key, 4)

    B, C, F, W = 2, 4, 16, 16          # in_channels = out_channels = 4, groups = 1
    in_c = out_c = C

    x = jax.random.normal(k1, (B, C, F, W), dtype=jnp.float32)
    conv_w = 0.1 * jax.random.normal(k2, (2 * out_c, 2 * in_c, 1, 1), dtype=jnp.float32)
    gamma = 1.0 + 0.1 * jax.random.normal(k3, (2 * out_c,), dtype=jnp.float32)
    beta = 0.1 * jax.random.normal(k4, (2 * out_c,), dtype=jnp.float32)

    ref = fourier_unit_ref(x, conv_w, gamma, beta)

    # Default (large) lane tile: single full-extent block per batch here.
    out = fourier_unit(x, conv_w, gamma, beta)
    jax.block_until_ready(out)
    assert out.shape == (B, out_c, F, W), out.shape
    np.testing.assert_allclose(np.asarray(out), np.asarray(ref), rtol=1e-4, atol=1e-4)

    # Small tile: exercises the multi-tile + overhanging-remainder (masked) path.
    out_small = fourier_unit(x, conv_w, gamma, beta, tile_n=128)
    jax.block_until_ready(out_small)
    np.testing.assert_allclose(np.asarray(out_small), np.asarray(ref), rtol=1e-4, atol=1e-4)

    print("KERNEL_OK")
</pallas_src>

<mosaic_0001>
module attributes {stable_mosaic.version = 11 : i64} {
  func.func @_stats_kernel(%arg0: i32, %arg1: i32, %arg2: memref<1x8x144xf32, #tpu.memory_space<vmem>>, %arg3: memref<8x8xf32, #tpu.memory_space<vmem>>, %arg4: memref<1x8x1xf32, #tpu.memory_space<vmem>>, %arg5: memref<1x8x1xf32, #tpu.memory_space<vmem>>) attributes {dimension_semantics = [#tpu.dimension_semantics<parallel>, #tpu.dimension_semantics<arbitrary>], iteration_bounds = array<i64: 2, 1>, scalar_prefetch = 0 : i64, scratch_operands = 0 : i64, tpu.core_type = #tpu.core_type<tc>, window_params = [{transform_indices = @transform_0, window_bounds = array<i64: 1, 8, 144>}, {pipeline_mode = #tpu.pipeline_mode<synchronous>, transform_indices = @transform_1, window_bounds = array<i64: 8, 8>}, {transform_indices = @transform_2, window_bounds = array<i64: 1, 8, 1>}, {transform_indices = @transform_3, window_bounds = array<i64: 1, 8, 1>}]} {
    %c0 = arith.constant 0 : index
    %c0_0 = arith.constant 0 : index
    %c0_1 = arith.constant 0 : index
    %0 = vector.load %arg2[%c0, %c0_0, %c0_1] : memref<1x8x144xf32, #tpu.memory_space<vmem>>, vector<1x8x144xf32>
    %1 = vector.shape_cast %0 : vector<1x8x144xf32> to vector<8x144xf32>
    %c0_2 = arith.constant 0 : index
    %c0_3 = arith.constant 0 : index
    %2 = vector.load %arg3[%c0_2, %c0_3] : memref<8x8xf32, #tpu.memory_space<vmem>>, vector<8x8xf32>
    %cst = arith.constant dense<0.000000e+00> : vector<8x144xf32>
    %3 = tpu.matmul %2, %1, %cst {dimension_numbers = #tpu.dot_dimension_numbers<[1], [0], [0], [1], [0, 0, 1, 1], [], []>} : vector<8x8xf32>, vector<8x144xf32>, vector<8x144xf32> -> vector<8x144xf32>
    %c0_i32 = arith.constant 0 : i32
    %4 = arith.cmpi eq, %arg1, %c0_i32 : i32
    %5 = arith.extui %4 : i1 to i32
    %c0_i32_4 = arith.constant 0 : i32
    %6 = arith.cmpi ne, %5, %c0_i32_4 : i32
    scf.if %6 {
      %cst_19 = arith.constant 0.000000e+00 : f32
      %24 = vector.broadcast %cst_19 : f32 to vector<8x1xf32>
      %c0_20 = arith.constant 0 : index
      %c0_21 = arith.constant 0 : index
      %c0_22 = arith.constant 0 : index
      %25 = vector.load %arg4[%c0_20, %c0_21, %c0_22] : memref<1x8x1xf32, #tpu.memory_space<vmem>>, vector<1x8x1xf32>
      %26 = vector.shape_cast %25 : vector<1x8x1xf32> to vector<8x1xf32>
      %27 = vector.shape_cast %24 : vector<8x1xf32> to vector<1x8x1xf32>
      tpu.vector_store %arg4[%c0_20, %c0_21, %c0_22], %27 {strides = array<i32>} : memref<1x8x1xf32, #tpu.memory_space<vmem>>, vector<1x8x1xf32>,
      %cst_23 = arith.constant 0.000000e+00 : f32
      %28 = vector.broadcast %cst_23 : f32 to vector<8x1xf32>
      %c0_24 = arith.constant 0 : index
      %c0_25 = arith.constant 0 : index
      %c0_26 = arith.constant 0 : index
      %29 = vector.load %arg5[%c0_24, %c0_25, %c0_26] : memref<1x8x1xf32, #tpu.memory_space<vmem>>, vector<1x8x1xf32>
      %30 = vector.shape_cast %29 : vector<1x8x1xf32> to vector<8x1xf32>
      %31 = vector.shape_cast %28 : vector<8x1xf32> to vector<1x8x1xf32>
      tpu.vector_store %arg5[%c0_24, %c0_25, %c0_26], %31 {strides = array<i32>} : memref<1x8x1xf32, #tpu.memory_space<vmem>>, vector<1x8x1xf32>,
    } else {
    }
    %c0_5 = arith.constant 0 : index
    %c0_6 = arith.constant 0 : index
    %c0_7 = arith.constant 0 : index
    %7 = vector.load %arg4[%c0_5, %c0_6, %c0_7] : memref<1x8x1xf32, #tpu.memory_space<vmem>>, vector<1x8x1xf32>
    %8 = vector.shape_cast %7 : vector<1x8x1xf32> to vector<8x1xf32>
    %cst_8 = arith.constant dense<0.000000e+00> : vector<8xf32>
    %9 = vector.multi_reduction <add>, %3, %cst_8 [1] : vector<8x144xf32> to vector<8xf32>
    %10 = vector.shape_cast %9 : vector<8xf32> to vector<8x1xf32>
    %11 = arith.addf %8, %10 : vector<8x1xf32>
    %c0_9 = arith.constant 0 : index
    %c0_10 = arith.constant 0 : index
    %c0_11 = arith.constant 0 : index
    %12 = vector.load %arg4[%c0_9, %c0_10, %c0_11] : memref<1x8x1xf32, #tpu.memory_space<vmem>>, vector<1x8x1xf32>
    %13 = vector.shape_cast %12 : vector<1x8x1xf32> to vector<8x1xf32>
    %14 = vector.shape_cast %11 : vector<8x1xf32> to vector<1x8x1xf32>
    tpu.vector_store %arg4[%c0_9, %c0_10, %c0_11], %14 {strides = array<i32>} : memref<1x8x1xf32, #tpu.memory_space<vmem>>, vector<1x8x1xf32>,
    %c0_12 = arith.constant 0 : index
    %c0_13 = arith.constant 0 : index
    %c0_14 = arith.constant 0 : index
    %15 = vector.load %arg5[%c0_12, %c0_13, %c0_14] : memref<1x8x1xf32, #tpu.memory_space<vmem>>, vector<1x8x1xf32>
    %16 = vector.shape_cast %15 : vector<1x8x1xf32> to vector<8x1xf32>
    %17 = arith.mulf %3, %3 : vector<8x144xf32>
    %cst_15 = arith.constant dense<0.000000e+00> : vector<8xf32>
    %18 = vector.multi_reduction <add>, %17, %cst_15 [1] : vector<8x144xf32> to vector<8xf32>
    %19 = vector.shape_cast %18 : vector<8xf32> to vector<8x1xf32>
    %20 = arith.addf %16, %19 : vector<8x1xf32>
    %c0_16 = arith.constant 0 : index
    %c0_17 = arith.constant 0 : index
    %c0_18 = arith.constant 0 : index
    %21 = vector.load %arg5[%c0_16, %c0_17, %c0_18] : memref<1x8x1xf32, #tpu.memory_space<vmem>>, vector<1x8x1xf32>
    %22 = vector.shape_cast %21 : vector<1x8x1xf32> to vector<8x1xf32>
    %23 = vector.shape_cast %20 : vector<8x1xf32> to vector<1x8x1xf32>
    tpu.vector_store %arg5[%c0_16, %c0_17, %c0_18], %23 {strides = array<i32>} : memref<1x8x1xf32, #tpu.memory_space<vmem>>, vector<1x8x1xf32>,
    return
  }
  func.func @transform_0(%arg0: i32, %arg1: i32) -> (i32, i32, i32) {
    %c0_i32 = arith.constant 0 : i32
    %c0_i32_0 = arith.constant 0 : i32
    return %arg0, %c0_i32, %arg1 : i32, i32, i32
  }
  func.func @transform_1(%arg0: i32, %arg1: i32) -> (i32, i32) {
    %c0_i32 = arith.constant 0 : i32
    %c0_i32_0 = arith.constant 0 : i32
    %c0_i32_1 = arith.constant 0 : i32
    return %c0_i32, %c0_i32_0 : i32, i32
  }
  func.func @transform_2(%arg0: i32, %arg1: i32) -> (i32, i32, i32) {
    %c0_i32 = arith.constant 0 : i32
    %c0_i32_0 = arith.constant 0 : i32
    %c0_i32_1 = arith.constant 0 : i32
    return %arg0, %c0_i32, %c0_i32_0 : i32, i32, i32
  }
  func.func @transform_3(%arg0: i32, %arg1: i32) -> (i32, i32, i32) {
    %c0_i32 = arith.constant 0 : i32
    %c0_i32_0 = arith.constant 0 : i32
    %c0_i32_1 = arith.constant 0 : i32
    return %arg0, %c0_i32, %c0_i32_0 : i32, i32, i32
  }
}

module attributes {stable_mosaic.version = 11 : i64} {
  func.func @_conv_bn_relu_kernel(%arg0: i32, %arg1: i32, %arg2: memref<1x8x144xf32, #tpu.memory_space<vmem>>, %arg3: memref<8x8xf32, #tpu.memory_space<vmem>>, %arg4: memref<8x1xf32, #tpu.memory_space<vmem>>, %arg5: memref<8x1xf32, #tpu.memory_space<vmem>>, %arg6: memref<1x8x144xf32, #tpu.memory_space<vmem>>) attributes {dimension_semantics = [#tpu.dimension_semantics<parallel>, #tpu.dimension_semantics<parallel>], iteration_bounds = array<i64: 2, 1>, scalar_prefetch = 0 : i64, scratch_operands = 0 : i64, tpu.core_type = #tpu.core_type<tc>, window_params = [{transform_indices = @transform_0, window_bounds = array<i64: 1, 8, 144>}, {pipeline_mode = #tpu.pipeline_mode<synchronous>, transform_indices = @transform_1, window_bounds = array<i64: 8, 8>}, {pipeline_mode = #tpu.pipeline_mode<synchronous>, transform_indices = @transform_2, window_bounds = array<i64: 8, 1>}, {pipeline_mode = #tpu.pipeline_mode<synchronous>, transform_indices = @transform_3, window_bounds = array<i64: 8, 1>}, {transform_indices = @transform_4, window_bounds = array<i64: 1, 8, 144>}]} {
    %c0 = arith.constant 0 : index
    %c0_0 = arith.constant 0 : index
    %0 = vector.load %arg3[%c0, %c0_0] : memref<8x8xf32, #tpu.memory_space<vmem>>, vector<8x8xf32>
    %c0_1 = arith.constant 0 : index
    %c0_2 = arith.constant 0 : index
    %c0_3 = arith.constant 0 : index
    %1 = vector.load %arg2[%c0_1, %c0_2, %c0_3] : memref<1x8x144xf32, #tpu.memory_space<vmem>>, vector<1x8x144xf32>
    %2 = vector.shape_cast %1 : vector<1x8x144xf32> to vector<8x144xf32>
    %cst = arith.constant dense<0.000000e+00> : vector<8x144xf32>
    %3 = tpu.matmul %0, %2, %cst {dimension_numbers = #tpu.dot_dimension_numbers<[1], [0], [0], [1], [0, 0, 1, 1], [], []>} : vector<8x8xf32>, vector<8x144xf32>, vector<8x144xf32> -> vector<8x144xf32>
    %c0_4 = arith.constant 0 : index
    %c0_5 = arith.constant 0 : index
    %4 = vector.load %arg4[%c0_4, %c0_5] : memref<8x1xf32, #tpu.memory_space<vmem>>, vector<8x1xf32>
    %5 = vector.broadcast %4 : vector<8x1xf32> to vector<8x144xf32>
    %6 = arith.mulf %3, %5 : vector<8x144xf32>
    %c0_6 = arith.constant 0 : index
    %c0_7 = arith.constant 0 : index
    %7 = vector.load %arg5[%c0_6, %c0_7] : memref<8x1xf32, #tpu.memory_space<vmem>>, vector<8x1xf32>
    %8 = vector.broadcast %7 : vector<8x1xf32> to vector<8x144xf32>
    %9 = arith.addf %6, %8 : vector<8x144xf32>
    %cst_8 = arith.constant 0.000000e+00 : f32
    %10 = vector.broadcast %cst_8 : f32 to vector<8x144xf32>
    %11 = arith.maximumf %9, %10 : vector<8x144xf32>
    %c0_9 = arith.constant 0 : index
    %c0_10 = arith.constant 0 : index
    %c0_11 = arith.constant 0 : index
    %12 = vector.load %arg6[%c0_9, %c0_10, %c0_11] : memref<1x8x144xf32, #tpu.memory_space<vmem>>, vector<1x8x144xf32>
    %13 = vector.shape_cast %12 : vector<1x8x144xf32> to vector<8x144xf32>
    %14 = vector.shape_cast %11 : vector<8x144xf32> to vector<1x8x144xf32>
    tpu.vector_store %arg6[%c0_9, %c0_10, %c0_11], %14 {strides = array<i32>} : memref<1x8x144xf32, #tpu.memory_space<vmem>>, vector<1x8x144xf32>,
    return
  }
  func.func @transform_0(%arg0: i32, %arg1: i32) -> (i32, i32, i32) {
    %c0_i32 = arith.constant 0 : i32
    %c0_i32_0 = arith.constant 0 : i32
    return %arg0, %c0_i32, %arg1 : i32, i32, i32
  }
  func.func @transform_1(%arg0: i32, %arg1: i32) -> (i32, i32) {
    %c0_i32 = arith.constant 0 : i32
    %c0_i32_0 = arith.constant 0 : i32
    %c0_i32_1 = arith.constant 0 : i32
    return %c0_i32, %c0_i32_0 : i32, i32
  }
  func.func @transform_2(%arg0: i32, %arg1: i32) -> (i32, i32) {
    %c0_i32 = arith.constant 0 : i32
    %c0_i32_0 = arith.constant 0 : i32
    %c0_i32_1 = arith.constant 0 : i32
    return %c0_i32, %c0_i32_0 : i32, i32
  }
  func.func @transform_3(%arg0: i32, %arg1: i32) -> (i32, i32) {
    %c0_i32 = arith.constant 0 : i32
    %c0_i32_0 = arith.constant 0 : i32
    %c0_i32_1 = arith.constant 0 : i32
    return %c0_i32, %c0_i32_0 : i32, i32
  }
  func.func @transform_4(%arg0: i32, %arg1: i32) -> (i32, i32, i32) {
    %c0_i32 = arith.constant 0 : i32
    %c0_i32_0 = arith.constant 0 : i32
    return %arg0, %c0_i32, %arg1 : i32, i32, i32
  }
}

</mosaic_0001>

<bundles_post_ra>
// kernel: reverse.1
= control target key start
LH: loop header
LB: loop body
LE: loop exit
PB: predicated region body
PF: predicated region fallthrough
CT: control target
= control target key end

     0   :  { %v2_v0 = vlaneseq  ;;  %s412_s0 = inlined_call_operand.vmem [shape: f32[2,4,16,7], index: 0, kind: input, shape index: {}]   ;;  %s413_s1 = inlined_call_operand.vmem [shape: f32[2,4,16,7], index: 1, kind: output, shape index: {}]  }
   0x1   :  { %v66_v2 = vld [vmem:[%s412_s0 + $0x10] sm:$0xff]  ;;  %v62_v3 = vld [vmem:[%s412_s0] sm:$0xff]  ;;  %v68_v4 = vld [vmem:[%s412_s0 + $0x18] sm:$0xff] }
   0x2   :  { %v3_v1 = vsub.s32 6, %v2_v0  ;;  %v64_v5 = vld [vmem:[%s412_s0 + $0x8] sm:$0xff]  ;;  %v70_v7 = vld [vmem:[%s412_s0 + $0x20] sm:$0xff]  ;;  %v76_v8 = vld [vmem:[%s412_s0 + $0x38] sm:$0xff] }
   0x3   :  { %v72_v6 = vld [vmem:[%s412_s0 + $0x28] sm:$0xff]  ;;  %v74_v9 = vld [vmem:[%s412_s0 + $0x30] sm:$0xff]  ;;  %v78_v11 = vld [vmem:[%s412_s0 + $0x40] sm:$0xff] }
   0x4   :  { %4 = vset.pattern.permute.xlu0 %v3_v1  ;;  %305 = vset.pattern.permute.xlu1 %v3_v1  ;;  %v80_v10 = vld [vmem:[%s412_s0 + $0x48] sm:$0xff]  ;;  %v84_v12 = vld [vmem:[%s412_s0 + $0x58] sm:$0xff]  ;;  %v82_v13 = vld [vmem:[%s412_s0 + $0x50] sm:$0xff] }
   0x5   :  { %110 = vperm.xlu1 %305, %v66_v2   ;;  %98 = vperm.xlu0 %4, %v62_v3   ;;  %v88_v14 = vld [vmem:[%s412_s0 + $0x68] sm:$0xff]  ;;  %v86_v15 = vld [vmem:[%s412_s0 + $0x60] sm:$0xff]  ;;  %v92_v16 = vld [vmem:[%s412_s0 + $0x78] sm:$0xff] }
   0x6   :  { %v90_v17 = vld [vmem:[%s412_s0 + $0x70] sm:$0xff] }
   0x9   :  { %116 = vperm.xlu1 %305, %v68_v4   ;;  %104 = vperm.xlu0 %4, %v64_v5  }
   0xd   :  { %128 = vperm.xlu1 %305, %v72_v6   ;;  %122 = vperm.xlu0 %4, %v70_v7  }
  0x11   :  { %140 = vperm.xlu1 %305, %v76_v8   ;;  %134 = vperm.xlu0 %4, %v74_v9  }
  0x15   :  { %152 = vperm.xlu1 %305, %v80_v10   ;;  %146 = vperm.xlu0 %4, %v78_v11  }
  0x19   :  { %164 = vperm.xlu1 %305, %v84_v12   ;;  %158 = vperm.xlu0 %4, %v82_v13  }
  0x1d   :  { %176 = vperm.xlu1 %305, %v88_v14   ;;  %170 = vperm.xlu0 %4, %v86_v15  }
  0x21   :  { %188 = vperm.xlu1 %305, %v92_v16   ;;  %182 = vperm.xlu0 %4, %v90_v17  }
  0x84   :  { %v111_v18 = vpop.permute.xlu1 %110  ;;  %v99_v19 = vpop.permute.xlu0 %98 }
  0x85   :  { %253 = vst [vmem:[%s413_s1 + $0x10] sm:$0xff] %v111_v18  ;;  %249 = vst [vmem:[%s413_s1] sm:$0xff] %v99_v19 }
  0x88   :  { %v117_v20 = vpop.permute.xlu1 %116  ;;  %v105_v21 = vpop.permute.xlu0 %104 }
  0x89   :  { %255 = vst [vmem:[%s413_s1 + $0x18] sm:$0xff] %v117_v20  ;;  %251 = vst [vmem:[%s413_s1 + $0x8] sm:$0xff] %v105_v21 }
  0x8c   :  { %v129_v22 = vpop.permute.xlu1 %128  ;;  %v123_v23 = vpop.permute.xlu0 %122 }
  0x8d   :  { %259 = vst [vmem:[%s413_s1 + $0x28] sm:$0xff] %v129_v22  ;;  %257 = vst [vmem:[%s413_s1 + $0x20] sm:$0xff] %v123_v23 }
  0x90   :  { %v141_v24 = vpop.permute.xlu1 %140  ;;  %v135_v25 = vpop.permute.xlu0 %134 }
  0x91   :  { %263 = vst [vmem:[%s413_s1 + $0x38] sm:$0xff] %v141_v24  ;;  %261 = vst [vmem:[%s413_s1 + $0x30] sm:$0xff] %v135_v25 }
  0x94   :  { %v153_v26 = vpop.permute.xlu1 %152  ;;  %v147_v27 = vpop.permute.xlu0 %146 }
  0x95   :  { %267 = vst [vmem:[%s413_s1 + $0x48] sm:$0xff] %v153_v26  ;;  %265 = vst [vmem:[%s413_s1 + $0x40] sm:$0xff] %v147_v27 }
  0x98   :  { %v165_v28 = vpop.permute.xlu1 %164  ;;  %v159_v29 = vpop.permute.xlu0 %158 }
  0x99   :  { %271 = vst [vmem:[%s413_s1 + $0x58] sm:$0xff] %v165_v28  ;;  %269 = vst [vmem:[%s413_s1 + $0x50] sm:$0xff] %v159_v29 }
  0x9c   :  { %v177_v30 = vpop.permute.xlu1 %176  ;;  %v171_v31 = vpop.permute.xlu0 %170 }
  0x9d   :  { %275 = vst [vmem:[%s413_s1 + $0x68] sm:$0xff] %v177_v30  ;;  %273 = vst [vmem:[%s413_s1 + $0x60] sm:$0xff] %v171_v31 }
  0xa0   :  { %v189_v32 = vpop.permute.xlu1 %188  ;;  %v183_v33 = vpop.permute.xlu0 %182 }
  0xa1   :  { %279 = vst [vmem:[%s413_s1 + $0x78] sm:$0xff] %v189_v32  ;;  %277 = vst [vmem:[%s413_s1 + $0x70] sm:$0xff] %v183_v33 }

// kernel: fourier_unit.2
= control target key start
LH: loop header
LB: loop body
LE: loop exit
PB: predicated region body
PF: predicated region fallthrough
CT: control target
= control target key end

     0   :  { %s492_s12 = smov 0   ;;  %s494_s13 = smov 0   ;;  %s535_s0 = inlined_call_operand.vmem [shape: f32[2,8,144], index: 0, kind: input, shape index: {}]   ;;  %s536_s1 = inlined_call_operand.vmem [shape: f32[8,8], index: 1, kind: input, shape index: {}]   ;;  %s537_s2 = inlined_call_operand.vmem [shape: f32[2,8,1], index: 2, kind: output, shape index: {0}]   ;;  %s538_s3 = inlined_call_operand.vmem [shape: f32[2,8,1], index: 3, kind: output, shape index: {1}]  }
   0x1   :  { %s496_s14 = smov 0  }
   0x2 LB: > { %s26_s15 = sadd.s32 1, %s465_s13  ;;  %p413_p0 = scmp.ge.s32.totalorder %s469_s14, 1  ;;  %s469_s14 = sphi %s496_s14, %s14_s14   ;;  %s465_s13 = sphi %s494_s13, %s540_s13   ;;  %s461_s12 = sphi %s492_s12, %s539_s12  }
   0x3   : > { %p28_p1 = scmp.ge.s32.totalorder %s26_s15, 2  ;;  %p159_p2 = scmp.lt.s32.totalorder %s469_s14, 3 }
   0x5   : > { %s542_s15 = smov (%p28_p1, %s26_s15), 0  ;;  %p160_p3 = pnand %p413_p0, %p159_p2 }
   0x6   : > { %p191_p4 = scmp.lt.s32.totalorder (!%p160_p3), %s461_s12, 1  ;;  %v471_v0 = vmov (!%p160_p3), 0.0   ;;  %v210_v3 = vld [vmem:[%s536_s1] sm:$0xff] (!%p160_p3)  ;;  %vm211_vm0 = vcmask (!%p160_p3), 64512   ;;  %vm290_vm1 = vcmask (!%p160_p3), 7168   ;;  %vm294_vm2 = vcmask (!%p160_p3), 130048  }
   0x7   : > { %163 = sbr.rel (%p160_p3) target bundleno = 385 (0x181), region = 28  ;;  %279 = vmatprep.mubr.f32.mxu0 (!%p160_p3), %v471_v0 }
   0xe   : > { %s544_s12 = smov (!%p191_p4, %s461_s12), 1 }
   0xf   : > { %s421_s16 = sshll.u32 %s544_s12, 4  ;;  %s416_s22 = sshll.u32 %s544_s12, 3 }
  0x10   : > { %s198_s19 = scalar_lea.vmem %s535_s0, %s421_s16  ;;  %s203_s25 = scalar_lea.vmem %s537_s2, %s416_s22 }
  0x11   : > { %v209_v1 = vld [vmem:[%s198_s19 + $0x8] sm:$0xff]  ;;  %v208_v2 = vld [vmem:[%s198_s19] sm:$0xff]  ;;  %291 = vst.msk [vmem:[%s203_s25] sm:$0xff] %vm290_vm1, %v471_v0  ;;  %s207_s28 = scalar_lea.vmem %s538_s3, %s416_s22 }
  0x12   : > { %215 = vmatprep.subr.mxu0 %v209_v1  ;;  %292 = vst.msk [vmem:[%s207_s28] sm:$0xff] %vm290_vm1, %v471_v0 }
  0x13   : > { %216 = vmatpush1.msra.mxu0 %v208_v2 }
  0x14   : > { %418 = vmatmul.mubr.msk.f32.vlgmr.msra.gmra.mrb[0].mxu0 %vm211_vm0, %v210_v3 }
  0x18   : > { %v293_v12 = vld [vmem:[%s203_s25] sm:$0xff] }
  0x19   : > { %v302_v15 = vld [vmem:[%s207_s28] sm:$0xff] }
  0xe7   : > { %v281_v4 = vpop.f32.mrb[0].mxu0 }
  0xe8   : > { %v283_v5 = vpop.f32.mrb[1].mxu0  ;;  %v303_v8 = vmul.f32 %v281_v4, %v281_v4 }
  0xe9   : > { %v295_v6 = vsel %vm294_vm2, %v283_v5, 0.0  ;;  %v304_v7 = vmul.f32 %v283_v5, %v283_v5 }
  0xea   : > { %v296_v9 = vadd.f32 %v295_v6, %v281_v4 }
  0xeb   : > { %v305_v10 = vsel %vm294_vm2, %v304_v7, 0.0 }
  0xec   : > { %297 = vadd.xlane.f32.xlu0 %v296_v9  ;;  %v306_v11 = vadd.f32 %v305_v10, %v303_v8 }
  0xf0   : > { %307 = vadd.xlane.f32.xlu0 %v306_v11 }
 0x179   : > { %v298_v13 = vpop.xlane.xlu0 %297 }
 0x17a   : > { %v299_v14 = vadd.f32 %v298_v13, %v293_v12 }
 0x17c   : > { %301 = vst.msk [vmem:[%s203_s25] sm:$0xff] %vm290_vm1, %v299_v14 }
 0x17d   : > { %v308_v16 = vpop.xlane.xlu0 %307 }
 0x17e   : > { %v309_v17 = vadd.f32 %v308_v16, %v302_v15 }
 0x180   : > { %310 = vst.msk [vmem:[%s207_s28] sm:$0xff] %vm290_vm1, %v309_v17 }
 0x181 PF: > { %s14_s14 = sadd.s32 1, %s469_s14   ;;  %s539_s12 = smov %s465_s13 }
 0x182   : > { %p11_p5 = scmp.ge.s32.totalorder %s14_s14, 4   ;;  %s540_s13 = smov %s542_s15 }
 0x184   :  { %13 = sbr.rel (!%p11_p5) target bundleno = 2 (0x2), region = 74 }

// kernel: fourier_unit.3
= control target key start
LH: loop header
LB: loop body
LE: loop exit
PB: predicated region body
PF: predicated region fallthrough
CT: control target
= control target key end

     0   :  { %s515_s15 = smov 0   ;;  %s517_s16 = smov 0   ;;  %s557_s0 = inlined_call_operand.vmem [shape: f32[2,8,144], index: 0, kind: input, shape index: {}]   ;;  %s558_s1 = inlined_call_operand.vmem [shape: f32[8,8], index: 1, kind: input, shape index: {}]   ;;  %s559_s2 = inlined_call_operand.vmem [shape: f32[8,1], index: 2, kind: input, shape index: {}]   ;;  %s560_s3 = inlined_call_operand.vmem [shape: f32[8,1], index: 3, kind: input, shape index: {}]   ;;  %s561_s4 = inlined_call_operand.vmem [shape: f32[2,8,144], index: 4, kind: output, shape index: {}]  }
   0x1   :  { %s519_s17 = smov 0  }
   0x2 LB: > { %s26_s18 = sadd.s32 1, %s482_s16  ;;  %p427_p0 = scmp.ge.s32.totalorder %s486_s17, 1  ;;  %s486_s17 = sphi %s519_s17, %s14_s17   ;;  %s482_s16 = sphi %s517_s16, %s563_s16   ;;  %s478_s15 = sphi %s515_s15, %s562_s15  }
   0x3   : > { %p28_p1 = scmp.ge.s32.totalorder %s26_s18, 2  ;;  %p183_p2 = scmp.lt.s32.totalorder %s486_s17, 3 }
   0x5   : > { %s565_s18 = smov (%p28_p1, %s26_s18), 0  ;;  %p184_p3 = pnand %p427_p0, %p183_p2 }
   0x6   : > { %p218_p4 = scmp.lt.s32.totalorder (!%p184_p3), %s478_s15, 1  ;;  %v315_v0 = vld [vmem:[%s559_s2] sm:$0xff] (!%p184_p3)  ;;  %v488_v1 = vmov (!%p184_p3), 0.0   ;;  %v489_v2 = vmov (!%p184_p3), 0   ;;  %vm240_vm0 = vcmask (!%p184_p3), 64512   ;;  %vm334_vm1 = vcmask (!%p184_p3), 130048  }
   0x7   : > { %187 = sbr.rel (%p184_p3) target bundleno = 240 (0xf0), region = 36  ;;  %308 = vmatprep.mubr.f32.mxu0 (!%p184_p3), %v488_v1  ;;  %463 = vset.pattern.permute.xlu0 (!%p184_p3), %v489_v2  ;;  %v323_v3 = vld [vmem:[%s560_s3] sm:$0xff] (!%p184_p3) }
   0x8   : > { %318 = vperm.xlu0 (!%p184_p3), %463, %v315_v0   ;;  %v237_v6 = vld [vmem:[%s558_s1] sm:$0xff] (!%p184_p3) }
   0xc   : > { %326 = vperm.xlu0 (!%p184_p3), %463, %v323_v3  }
   0xe   : > { %s567_s15 = smov (!%p218_p4, %s478_s15), 1 }
   0xf   : > { %s435_s23 = sshll.u32 %s567_s15, 4 }
  0x10   : > { %s225_s26 = scalar_lea.vmem %s557_s0, %s435_s23  ;;  %s235_s5 = scalar_lea.vmem %s561_s4, %s435_s23 }
  0x11   : > { %v239_v4 = vld [vmem:[%s225_s26 + $0x8] sm:$0xff]  ;;  %v238_v5 = vld [vmem:[%s225_s26] sm:$0xff] }
  0x12   : > { %244 = vmatprep.subr.mxu0 %v239_v4 }
  0x13   : > { %245 = vmatpush1.msra.mxu0 %v238_v5 }
  0x14   : > { %432 = vmatmul.mubr.msk.f32.vlgmr.msra.gmra.mrb[0].mxu0 %vm240_vm0, %v237_v6 }
  0x87   : > { %v319_v7 = vpop.permute.xlu0 %318 }
  0x8b   : > { %v327_v11 = vpop.permute.xlu0 %326 }
  0xe7   : > { %v310_v8 = vpop.f32.mrb[0].mxu0 }
  0xe8   : > { %v321_v9 = vmul.f32 %v319_v7, %v310_v8  ;;  %v312_v10 = vpop.f32.mrb[1].mxu0 }
  0xe9   : > { %v322_v12 = vmul.f32 %v319_v7, %v312_v10 }
  0xea   : > { %v329_v13 = vadd.f32 %v327_v11, %v321_v9 }
  0xeb   : > { %v330_v14 = vadd.f32 %v327_v11, %v322_v12 }
  0xec   : > { %v331_v15 = vmax.f32 %v329_v13, 0.0 }
  0xed   : > { %v332_v16 = vmax.f32 %v330_v14, 0.0 }
  0xee   : > { %333 = vst [vmem:[%s235_s5] sm:$0xff] %v331_v15 }
  0xef   : > { %335 = vst.msk [vmem:[%s235_s5 + $0x8] sm:$0xff] %vm334_vm1, %v332_v16 }
  0xf0 PF: > { %s14_s17 = sadd.s32 1, %s486_s17   ;;  %s562_s15 = smov %s482_s16 }
  0xf1   : > { %p11_p5 = scmp.ge.s32.totalorder %s14_s17, 4   ;;  %s563_s16 = smov %s565_s18 }
  0xf3   :  { %13 = sbr.rel (!%p11_p5) target bundleno = 2 (0x2), region = 66 }

</bundles_post_ra>
